<compile_context>
chip_gen: v7x
topology: tpu7x:2x2x1
jax: 0.10.0
libtpu: 0.0.40
codegen_flags: <defaults>
</compile_context>

<pallas_src>
import math

import jax
import jax.numpy as jnp
from jax import lax
from jax.experimental import pallas as pl
from jax.experimental.pallas import tpu as pltpu


_SMALL_N_MAX = 1024                    # whole-problem-in-VMEM path for n <= this
_VMEM_BUDGET = 24 * 1024 * 1024        # fits the default scoped VMEM limit on v5e/v6e/v7x


def _linear_kernel(x_ref, w_ref, b_ref, o_ref):
    # x_ref: (TN, D), w_ref: (W, D), b_ref: (1, W), o_ref: (TN, W)
    # Contract on the last dims of both operands -> no wrapper transpose, no
    # HBM padding; Mosaic feeds the MXU and pads in VMEM.
    logits = lax.dot_general(
        x_ref[...], w_ref[...],
        dimension_numbers=(((1,), (1,)), ((), ())),
        preferred_element_type=jnp.float32,
    )
    o_ref[...] = (logits + b_ref[...].astype(jnp.float32)).astype(o_ref.dtype)


def _batched_linear_kernel(x_ref, w_ref, b_ref, o_ref):
    # x_ref: (G, N, D), w_ref: (G, W, D), b_ref: (G, 1, W), o_ref: (G, N, W)
    logits = lax.dot_general(
        x_ref[...], w_ref[...],
        dimension_numbers=(((2,), (2,)), ((0,), (0,))),
        preferred_element_type=jnp.float32,
    )
    o_ref[...] = (logits + b_ref[...].astype(jnp.float32)).astype(o_ref.dtype)


def _pick_row_tile(n, d, way, itemsize):
    # Double-buffered x tile + double-buffered output tile + resident weight/bias.
    for tn in (1024, 512, 256, 128, 64, 32, 16, 8):
        need = 2 * tn * d * itemsize + 2 * tn * way * itemsize \
               + way * d * itemsize + way * itemsize + 1024
        if need <= _VMEM_BUDGET and tn <= max(8, n):
            return tn
    return 8


def base_learner_forward(input_x, fc1_w, fc1_b):
    """Pallas BaseLearner.forward for a single task.

    input_x: [N, z_dim], fc1_w: [way, z_dim], fc1_b: [way] -> [N, way]
    """
    n, d = input_x.shape
    way, d_w = fc1_w.shape
    assert d == d_w, "feature dims must match"
    dtype = input_x.dtype
    itemsize = jnp.dtype(dtype).itemsize
    b2 = fc1_b.reshape(1, way)         # metadata-only reshape

    cost = pl.CostEstimate(
        flops=2 * n * d * way,
        transcendentals=0,
        bytes_accessed=(input_x.size + fc1_w.size + fc1_b.size + n * way) * itemsize,
    )

    if n <= _SMALL_N_MAX:
        # Whole problem in VMEM: no pads, no slice, no grid.
        return pl.pallas_call(
            _linear_kernel,
            out_shape=jax.ShapeDtypeStruct((n, way), dtype),
            in_specs=[
                pl.BlockSpec(memory_space=pltpu.MemorySpace.VMEM),
                pl.BlockSpec(memory_space=pltpu.MemorySpace.VMEM),
                pl.BlockSpec(memory_space=pltpu.MemorySpace.VMEM),
            ],
            out_specs=pl.BlockSpec(memory_space=pltpu.MemorySpace.VMEM),
            cost_estimate=cost,
        )(input_x, fc1_w, b2)

    # Large N: row-tiled grid (pl.cdiv -> no row padding in HBM); weight and
    # bias stay resident via constant index_maps.
    tn = _pick_row_tile(n, d, way, itemsize)
    grid = (pl.cdiv(n, tn),)

    return pl.pallas_call(
        _linear_kernel,
        out_shape=jax.ShapeDtypeStruct((n, way), dtype),
        grid=grid,
        in_specs=[
            pl.BlockSpec((tn, d), lambda i: (i, 0)),
            pl.BlockSpec((way, d), lambda i: (0, 0)),   # resident weight
            pl.BlockSpec((1, way), lambda i: (0, 0)),   # resident bias
        ],
        out_specs=pl.BlockSpec((tn, way), lambda i: (i, 0)),
        compiler_params=pltpu.CompilerParams(
            dimension_semantics=("parallel",),
        ),
        cost_estimate=cost,
    )(input_x, fc1_w, b2)


def base_learner_forward_batched(input_x, fc1_w, fc1_b):
    """Task-batched forward: one pallas_call for all MTL inner-loop tasks.

    input_x: [T, N, z_dim], fc1_w: [T, way, z_dim], fc1_b: [T, way] -> [T, N, way]
    """
    t, n, d = input_x.shape
    t_w, way, d_w = fc1_w.shape
    assert d == d_w and t == t_w and fc1_b.shape == (t, way)
    dtype = input_x.dtype
    itemsize = jnp.dtype(dtype).itemsize
    b3 = fc1_b.reshape(t, 1, way)

    # Pack G tasks per grid step: each per-task matmul is << the ~0.35us grid
    # step overhead, so keep the grid short.  Use 2 groups when possible so
    # v7x's two TensorCores both get work; split further only if VMEM needs it.
    per_task = (n * d + way * d + way + n * way) * itemsize
    num_groups = 2 if t >= 2 else 1
    while num_groups < t and 2 * pl.cdiv(t, num_groups) * per_task > _VMEM_BUDGET:
        num_groups *= 2
    num_groups = min(num_groups, t)
    g = pl.cdiv(t, num_groups)
    grid = (pl.cdiv(t, g),)

    cost = pl.CostEstimate(
        flops=2 * t * n * d * way,
        transcendentals=0,
        bytes_accessed=(input_x.size + fc1_w.size + fc1_b.size + t * n * way) * itemsize,
    )

    return pl.pallas_call(
        _batched_linear_kernel,
        out_shape=jax.ShapeDtypeStruct((t, n, way), dtype),
        grid=grid,
        in_specs=[
            pl.BlockSpec((g, n, d), lambda i: (i, 0, 0)),
            pl.BlockSpec((g, way, d), lambda i: (i, 0, 0)),
            pl.BlockSpec((g, 1, way), lambda i: (i, 0, 0)),
        ],
        out_specs=pl.BlockSpec((g, n, way), lambda i: (i, 0, 0)),
        compiler_params=pltpu.CompilerParams(
            dimension_semantics=("parallel",),
        ),
        cost_estimate=cost,
    )(input_x, fc1_w, b3)


def init_params(key, way, z_dim, dtype=jnp.float32):
    """Mirror of the module __init__: kaiming_uniform_(a=0) weight, zero bias."""
    bound = math.sqrt(6.0 / z_dim)     # gain*sqrt(3/fan_in) with gain=sqrt(2)
    fc1_w = jax.random.uniform(
        key, (way, z_dim), dtype=dtype, minval=-bound, maxval=bound
    )
    fc1_b = jnp.zeros((way,), dtype=dtype)
    return fc1_w, fc1_b


if __name__ == "__main__":
    # Shapes consistent with the module: 5-way head, z_dim=64 features,
    # N=16 query examples; 4 tasks for the batched entry point.
    way, z_dim, n, n_tasks = 5, 64, 16, 4

    key = jax.random.PRNGKey(0)
    k_x, k_w, k_xl, k_xb, k_wb = jax.random.split(key, 5)

    # --- single-task forward, small-N path (whole problem in VMEM) -------
    input_x = jax.random.normal(k_x, (n, z_dim), dtype=jnp.float32)
    fc1_w, fc1_b = init_params(k_w, way, z_dim)

    logits = jax.block_until_ready(base_learner_forward(input_x, fc1_w, fc1_b))
    ref = input_x @ fc1_w.T + fc1_b
    assert logits.shape == (n, way)
    assert jnp.allclose(logits, ref, atol=1e-5, rtol=1e-5)

    # --- single-task forward, row-tiled path (n > 1024, uneven tail tile) -
    n_big = 2048 + 24
    x_big = jax.random.normal(k_xl, (n_big, z_dim), dtype=jnp.float32)
    logits_big = jax.block_until_ready(base_learner_forward(x_big, fc1_w, fc1_b))
    ref_big = x_big @ fc1_w.T + fc1_b
    assert logits_big.shape == (n_big, way)
    assert jnp.allclose(logits_big, ref_big, atol=1e-4, rtol=1e-5)

    # --- task-batched forward (tasks packed into a 2-step grid) -----------
    xb = jax.random.normal(k_xb, (n_tasks, n, z_dim), dtype=jnp.float32)
    wb = jax.random.uniform(
        k_wb, (n_tasks, way, z_dim), dtype=jnp.float32,
        minval=-math.sqrt(6.0 / z_dim), maxval=math.sqrt(6.0 / z_dim))
    bb = jnp.zeros((n_tasks, way), dtype=jnp.float32)

    logits_b = jax.block_until_ready(base_learner_forward_batched(xb, wb, bb))
    ref_b = jnp.einsum("tnd,twd->tnw", xb, wb) + bb[:, None, :]
    assert logits_b.shape == (n_tasks, n, way)
    assert jnp.allclose(logits_b, ref_b, atol=1e-5, rtol=1e-5)

    print("KERNEL_OK")
</pallas_src>

<mosaic_0001>
module attributes {stable_mosaic.version = 11 : i64} {
  func.func @_linear_kernel(%arg0: memref<16x64xf32, #tpu.memory_space<vmem>>, %arg1: memref<5x64xf32, #tpu.memory_space<vmem>>, %arg2: memref<1x5xf32, #tpu.memory_space<vmem>>, %arg3: memref<16x5xf32, #tpu.memory_space<vmem>>) attributes {dimension_semantics = [], scalar_prefetch = 0 : i64, scratch_operands = 0 : i64, tpu.core_type = #tpu.core_type<tc>} {
    %c0 = arith.constant 0 : index
    %c0_0 = arith.constant 0 : index
    %0 = vector.load %arg0[%c0, %c0_0] : memref<16x64xf32, #tpu.memory_space<vmem>>, vector<16x64xf32>
    %c0_1 = arith.constant 0 : index
    %c0_2 = arith.constant 0 : index
    %1 = vector.load %arg1[%c0_1, %c0_2] : memref<5x64xf32, #tpu.memory_space<vmem>>, vector<5x64xf32>
    %cst = arith.constant dense<0.000000e+00> : vector<16x5xf32>
    %2 = tpu.matmul %0, %1, %cst {dimension_numbers = #tpu.dot_dimension_numbers<[1], [1], [0], [0], [0, 0, 1, 0], [], []>} : vector<16x64xf32>, vector<5x64xf32>, vector<16x5xf32> -> vector<16x5xf32>
    %c0_3 = arith.constant 0 : index
    %c0_4 = arith.constant 0 : index
    %3 = vector.load %arg2[%c0_3, %c0_4] : memref<1x5xf32, #tpu.memory_space<vmem>>, vector<1x5xf32>
    %4 = vector.broadcast %3 : vector<1x5xf32> to vector<16x5xf32>
    %5 = arith.addf %2, %4 : vector<16x5xf32>
    %c0_5 = arith.constant 0 : index
    %c0_6 = arith.constant 0 : index
    %6 = vector.load %arg3[%c0_5, %c0_6] : memref<16x5xf32, #tpu.memory_space<vmem>>, vector<16x5xf32>
    tpu.vector_store %arg3[%c0_5, %c0_6], %5 {strides = array<i32>} : memref<16x5xf32, #tpu.memory_space<vmem>>, vector<16x5xf32>,
    return
  }
}

</mosaic_0001>

<bundles_post_ra>
// kernel: tpu_custom_call.1
= control target key start
LH: loop header
LB: loop body
LE: loop exit
PB: predicated region body
PF: predicated region fallthrough
CT: control target
= control target key end

     0   :  { %8 = vsyncpa [#allocation3], 0  ;;  %s265_s0 = inlined_call_operand.hbm [shape: f32[16,64], index: 0, kind: input, shape index: {}]   ;;  %s266_s1 = inlined_call_operand.hbm [shape: f32[5,64], index: 1, kind: input, shape index: {}]   ;;  %s267_s2 = inlined_call_operand.vmem [shape: f32[1,5], index: 2, kind: input, shape index: {}]   ;;  %s268_s3 = inlined_call_operand.vmem [shape: f32[16,5], index: 3, kind: output, shape index: {}]  }
   0x1   :  { %9 = vsyncpa [#allocation5], 0  ;;  %s208_s12 = smov [#allocation2]   ;;  %s160_s16 = scalar_lea.hbm %s265_s0, 256 }
   0x2   :  { %s15_s13 = sshll.u32 %s208_s12, 4  ;;  %p161_p0 = scmp.ne.s32.totalorder %s265_s0, %s160_s16  ;;  %s16_s13 = int_to_ptr.vmem [resolvable:$true] %s15_s13 }
   0x3   :  { %p164_p1 = scmp.lt.u32.totalorder %s160_s16, %s265_s0 }
   0x5   :  { %p166_p2 = pnand %p164_p1, %p161_p0 }
   0x7   :  { %169 = shalt.err (!%p166_p2)
}
   0x8   :  { %s170_s21 = scalar_lea.vmem %s16_s13, 256  ;;  %p175_p4 = scmp.lt.s32.totalorder %s16_s13, %s16_s13 }
   0x9   :  { %p171_p3 = scmp.ne.s32.totalorder %s16_s13, %s170_s21  ;;  %p176_p5 = scmp.lt.s32.totalorder %s170_s21, %s170_s21 }
   0xb   :  { %p177_p6 = por %p176_p5, %p175_p4 }
   0xd   :  { %p178_p7 = pnand %p177_p6, %p171_p3 }
   0xf   :  { %181 = shalt.err (!%p178_p7)
}
  0x10   :  { %s209_s22 = smov 128   ;;  %s210_s23 = smov 8  }
  0x11   :  { %21 = dma.hbm_to_vmem [thread:$0]  %s265_s0, 256, %s16_s13, [#allocation3], %s209_s22, %s209_s22, %s210_s23  }
  0x12   :  { %s211_s26 = smov [#allocation4]   ;;  %s182_s30 = scalar_lea.hbm %s266_s1, 128 }
  0x13   :  { %s28_s27 = sshll.u32 %s211_s26, 4  ;;  %p183_p8 = scmp.ne.s32.totalorder %s266_s1, %s182_s30  ;;  %s29_s27 = int_to_ptr.vmem [resolvable:$true] %s28_s27 }
  0x14   :  { %p186_p9 = scmp.lt.u32.totalorder %s182_s30, %s266_s1 }
  0x16   :  { %p188_p10 = pnand %p186_p9, %p183_p8 }
  0x18   :  { %191 = shalt.err (!%p188_p10)
}
  0x19   :  { %s192_s8 = scalar_lea.vmem %s29_s27, 128  ;;  %p197_p12 = scmp.lt.s32.totalorder %s29_s27, %s29_s27 }
  0x1a   :  { %p193_p11 = scmp.ne.s32.totalorder %s29_s27, %s192_s8  ;;  %p198_p13 = scmp.lt.s32.totalorder %s192_s8, %s192_s8 }
  0x1c   :  { %p199_p0 = por %p198_p13, %p197_p12 }
  0x1e   :  { %p200_p1 = pnand %p199_p0, %p193_p11 }
  0x20   :  { %203 = shalt.err (!%p200_p1)
}
  0x21   :  { %31 = dma.hbm_to_vmem [thread:$0]  %s266_s1, 128, %s29_s27, [#allocation5]  }
  0x22   :  { %204 = dma.done.wait [#allocation3], 256  }
  0x23   :  { %205 = vsyncadd [#allocation3], 4294967040 }
  0x24   :  { %206 = dma.done.wait [#allocation5], 128  }
  0x25   :  { %207 = vsyncadd [#allocation5], 4294967168  ;;  %vm50_vm0 = vcmask 523264   ;;  %v42_v0 = vld [vmem:[#allocation4] sm:$0x1f]  ;;  %v40_v1 = vld [vmem:[#allocation2] sm:$0xff] }
  0x26   :  { %151 = vmatprep.subr.msk.mxu0 %vm50_vm0, %v42_v0  ;;  %153 = vmatprep.mubr.msk.f32.mxu0 %vm50_vm0, %v40_v1  ;;  %v41_v2 = vld [vmem:[#allocation2 + $0x8] sm:$0xff]  ;;  %v144_v3 = vld [vmem:[%s267_s2] ss:$0 sm:$0xff]  ;;  %vm135_vm1 = vcmask 39936  }
  0x27   :  { %152 = vmatpush3.xpose.msk.msra.mxu0 %vm50_vm0, %v42_v0 }
  0x2a   :  { %154 = vmatmul.mubr.msk.f32.vlgmr.msra.gmra.mrb[0].mxu0 %vm50_vm0, %v41_v2 }
  0xfd   :  { %v155_v4 = vpop.f32.mrb[0].mxu0 }
  0xfe   :  { %v132_v5 = vadd.f32 %v155_v4, %v144_v3  ;;  %v126_v6 = vpop.f32.mrb[1].mxu0 }
  0xff   :  { %v127_v7 = vadd.f32 %v144_v3, %v126_v6 }
 0x100   :  { %137 = vst.msk [vmem:[%s268_s3 + $0x8] sm:$0xff] %vm135_vm1, %v132_v5 }
 0x101   :  { %136 = vst.msk [vmem:[%s268_s3] sm:$0xff] %vm135_vm1, %v127_v7 }
 0x102   :  { %142 = vsyncpa [#allocation3], 1 }
 0x103   :  { %143 = vsyncpa [#allocation5], 1 }

</bundles_post_ra>
